<compile_context>
chip_gen: v7x
topology: tpu7x:2x2x1
jax: 0.10.0
libtpu: 0.0.40
codegen_flags: <defaults>
</compile_context>

<pallas_src>
import jax
import jax.numpy as jnp
from jax.experimental import pallas as pl
from jax.experimental.pallas import tpu as pltpu


def _copy_kernel(x_ref, o_ref):
    # Straight identity copy of the current tile (reshape = data movement).
    o_ref[...] = x_ref[...]


def _round_up(n, m):
    return ((n + m - 1) // m) * m


def _round_down(n, m):
    return (n // m) * m


def _vmem_capacity_bytes():
    """Per-TensorCore VMEM capacity; conservative fallback if query fails."""
    try:
        cap = int(pltpu.get_tpu_info().vmem_capacity_bytes)
        if cap > 0:
            return cap
    except Exception:
        pass
    return 64 << 20  # v7x per-core VMEM (smallest of the three generations)


def _device_kind():
    try:
        return jax.devices()[0].device_kind.lower()
    except Exception:
        return ""


def _pick_block_bytes():
    """Per-generation block size for a pure-bandwidth copy.

    v7x : 64 MiB VMEM, highest HBM BW -> ~10 MiB blocks (live ~4x = 40 MiB).
    v6e : 128 MiB VMEM, ~1.4 TB/s     -> 16 MiB blocks (per-step overhead ~2%).
    v5e : 128 MiB VMEM, ~0.8 TB/s     ->  8 MiB blocks already <4% overhead.
    """
    vmem_cap = _vmem_capacity_bytes()
    kind = _device_kind()
    if vmem_cap <= (64 << 20) or "v7" in kind:
        block = 10 << 20
    elif "v5" in kind:
        block = 8 << 20
    else:  # v6e-class 128 MiB parts
        block = 16 << 20
    block = min(block, max(1 << 20, vmem_cap // 6))
    return block, vmem_cap


# Keep >= 4 grid steps for mid-size tensors so the DMA pipeline overlaps and
# the v7x 2-TC megacore can shard the "parallel" axis -- but only when each
# step still moves >= ~1 MiB (otherwise per-step overhead dominates).
_MIN_STEPS = 4
_MIN_STEP_BYTES = 1 << 20


def _vmem_limit(block_bytes, vmem_cap):
    # Input + output, each double-buffered -> live footprint ~= 4 * block.
    # Allow ~5x (with a 32 MiB floor) but stay <= 75% of physical VMEM.
    return int(min(vmem_cap * 3 // 4, max(32 << 20, 5 * block_bytes)))


def _compiler_params(vmem_limit):
    return pltpu.CompilerParams(
        # "parallel" lets v7x shard the copy grid across its 2 TensorCores.
        dimension_semantics=("parallel",),
        vmem_limit_bytes=vmem_limit,
    )


def _copy_2d(flat2d, target_block_bytes, vmem_cap):
    """Pipelined identity copy of a lane-dense (rows, lanes) slab."""
    rows, lanes = flat2d.shape
    itemsize = flat2d.dtype.itemsize
    bytes_per_row = lanes * itemsize

    # Row tile multiple of 32 covers sublane packing for f32/bf16/int8/fp8,
    # so every full block uses unmasked wide vector stores.
    row_align = 32
    tr = max(row_align, _round_down(target_block_bytes // bytes_per_row, row_align))

    # Mid-size tensors: shrink the tile so the grid has >= _MIN_STEPS steps.
    if rows * bytes_per_row >= _MIN_STEPS * _MIN_STEP_BYTES:
        tr_split = max(row_align, _round_down(rows // _MIN_STEPS, row_align))
        tr = min(tr, tr_split)

    # Never allocate a block far bigger than the data itself.
    tr = min(tr, _round_up(rows, row_align))

    block_bytes = tr * bytes_per_row
    return pl.pallas_call(
        _copy_kernel,
        out_shape=jax.ShapeDtypeStruct((rows, lanes), flat2d.dtype),
        grid=(pl.cdiv(rows, tr),),  # partial last block is masked by Pallas
        in_specs=[pl.BlockSpec((tr, lanes), lambda i: (i, 0))],
        out_specs=pl.BlockSpec((tr, lanes), lambda i: (i, 0)),
        compiler_params=_compiler_params(_vmem_limit(block_bytes, vmem_cap)),
    )(flat2d)


def _copy_1d(flat, target_block_bytes, vmem_cap):
    """Ragged fallback (total % 128 != 0): tile the flat 1-D array with
    lane-aligned blocks; Pallas masks the partial tail block in-kernel, so no
    wrapper-side pad / slice (and no extra HBM traffic) is needed."""
    (total,) = flat.shape
    itemsize = flat.dtype.itemsize

    elem_align = 4096  # 32 sublanes x 128 lanes: covers packing for all dtypes
    be = max(elem_align, _round_down(target_block_bytes // itemsize, elem_align))
    if total * itemsize >= _MIN_STEPS * _MIN_STEP_BYTES:
        be = min(be, max(elem_align, _round_down(total // _MIN_STEPS, elem_align)))
    be = min(be, _round_up(total, elem_align))

    block_bytes = be * itemsize
    return pl.pallas_call(
        _copy_kernel,
        out_shape=jax.ShapeDtypeStruct((total,), flat.dtype),
        grid=(pl.cdiv(total, be),),  # partial last block is masked by Pallas
        in_specs=[pl.BlockSpec((be,), lambda i: (i,))],
        out_specs=pl.BlockSpec((be,), lambda i: (i,)),
        compiler_params=_compiler_params(_vmem_limit(block_bytes, vmem_cap)),
    )(flat)


def _resolve_shape(target_shape, total):
    """PyTorch reshape semantics, including -1 inference and size checking."""
    shape = list(target_shape)
    if -1 in shape:
        idx = shape.index(-1)
        known = 1
        for i, s in enumerate(shape):
            if i != idx:
                known *= s
        if known == 0 or total % known != 0:
            raise ValueError(f"cannot reshape size {total} into {tuple(target_shape)}")
        shape[idx] = total // known
    else:
        prod = 1
        for s in shape:
            prod *= s
        if prod != total:
            raise ValueError(f"cannot reshape size {total} into {tuple(target_shape)}")
    return tuple(shape)


_LANE_CANDIDATES = (4096, 2048, 1024, 512, 256, 128)


def pallas_reshape(x, target_shape):
    """Reproduces x.reshape(target_shape); the data copy runs in Pallas."""
    total = x.size
    shape = _resolve_shape(target_shape, total)

    if total == 0:
        return jnp.reshape(x, shape)  # nothing to copy; avoid a 0-length grid

    # TODO(synk): for contiguous inputs reshape is metadata-only in XLA, so the
    # copy could be skipped entirely (or aliased via input_output_aliases when
    # the caller donates x); the copy is kept so the data path exercises Pallas.

    target_block_bytes, vmem_cap = _pick_block_bytes()
    flat = jnp.reshape(x, (-1,))  # metadata-only: x is contiguous

    # Widest lane-dense view that exactly divides the element count: longer
    # unmasked store runs and larger contiguous DMA bursts, no pad/slice.
    lanes = next((l for l in _LANE_CANDIDATES if total % l == 0), None)
    if lanes is not None:
        out = _copy_2d(
            jnp.reshape(flat, (total // lanes, lanes)), target_block_bytes, vmem_cap
        )
    else:
        out = _copy_1d(flat, target_block_bytes, vmem_cap)

    return jnp.reshape(out, shape)


if __name__ == "__main__":
    key = jax.random.PRNGKey(0)
    # Small NCHW input consistent with a conv-style feature map.
    x = jax.random.normal(key, (2, 4, 16, 16), dtype=jnp.float32)

    # Typical flatten-for-classifier target shape: (batch, C*H*W).
    target_shape = (2, 4 * 16 * 16)

    y = pallas_reshape(x, target_shape)
    y = jax.block_until_ready(y)

    # Verify against plain JAX reshape (same C-order semantics as PyTorch).
    ref = jnp.reshape(x, target_shape)
    assert y.shape == ref.shape, (y.shape, ref.shape)
    assert y.dtype == ref.dtype
    assert bool(jnp.all(y == ref))

    print("KERNEL_OK")
</pallas_src>

<mosaic_0001>
module attributes {stable_mosaic.version = 11 : i64} {
  func.func @_copy_kernel(%arg0: i32, %arg1: memref<32x2048xf32, #tpu.memory_space<vmem>>, %arg2: memref<32x2048xf32, #tpu.memory_space<vmem>>) attributes {dimension_semantics = [#tpu.dimension_semantics<parallel>], iteration_bounds = array<i64: 1>, scalar_prefetch = 0 : i64, scratch_operands = 0 : i64, tpu.core_type = #tpu.core_type<tc>, window_params = [{transform_indices = @transform_0, window_bounds = array<i64: 32, 2048>}, {transform_indices = @transform_1, window_bounds = array<i64: 32, 2048>}]} {
    %c0 = arith.constant 0 : index
    %c0_0 = arith.constant 0 : index
    %0 = vector.load %arg1[%c0, %c0_0] : memref<32x2048xf32, #tpu.memory_space<vmem>>, vector<32x2048xf32>
    %c0_1 = arith.constant 0 : index
    %c0_2 = arith.constant 0 : index
    %1 = vector.load %arg2[%c0_1, %c0_2] : memref<32x2048xf32, #tpu.memory_space<vmem>>, vector<32x2048xf32>
    tpu.vector_store %arg2[%c0_1, %c0_2], %0 {strides = array<i32>} : memref<32x2048xf32, #tpu.memory_space<vmem>>, vector<32x2048xf32>,
    return
  }
  func.func @transform_0(%arg0: i32) -> (i32, i32) {
    %c0_i32 = arith.constant 0 : i32
    %c0_i32_0 = arith.constant 0 : i32
    return %arg0, %c0_i32 : i32, i32
  }
  func.func @transform_1(%arg0: i32) -> (i32, i32) {
    %c0_i32 = arith.constant 0 : i32
    %c0_i32_0 = arith.constant 0 : i32
    return %arg0, %c0_i32 : i32, i32
  }
}

</mosaic_0001>

<bundles_post_ra>
// kernel: tpu_custom_call.1
= control target key start
LH: loop header
LB: loop body
LE: loop exit
PB: predicated region body
PF: predicated region fallthrough
CT: control target
= control target key end

     0   :  { %6 = vsyncpa [#allocation3], 0  ;;  %s264_s0 = inlined_call_operand.hbm [shape: f32[1,2048], index: 0, kind: input, shape index: {}]   ;;  %s265_s1 = inlined_call_operand.hbm [shape: f32[1,2048], index: 1, kind: output, shape index: {}]  }
   0x1   :  { %7 = vsyncpa [#allocation4], 0 }
   0x2   :  { %12 = vsyncadd [#allocation3], 7936  ;;  %s220_s6 = smov [#allocation2]   ;;  %s172_s10 = scalar_lea.hbm %s264_s0, 256 }
   0x3   :  { %s13_s7 = sshll.u32 %s220_s6, 4  ;;  %p173_p0 = scmp.ne.s32.totalorder %s264_s0, %s172_s10  ;;  %s14_s7 = int_to_ptr.vmem [resolvable:$true] %s13_s7 }
   0x4   :  { %p176_p1 = scmp.lt.u32.totalorder %s172_s10, %s264_s0 }
   0x6   :  { %p178_p2 = pnand %p176_p1, %p173_p0 }
   0x8   :  { %181 = shalt.err (!%p178_p2)
}
   0x9   :  { %s182_s15 = scalar_lea.vmem %s14_s7, 256  ;;  %s186_s16 = scalar_lea.vmem %s14_s7, 8192 }
   0xa   :  { %p183_p3 = scmp.ne.s32.totalorder %s14_s7, %s182_s15  ;;  %p187_p4 = scmp.lt.s32.totalorder %s14_s7, %s14_s7 }
   0xb   :  { %p188_p5 = scmp.lt.s32.totalorder %s186_s16, %s182_s15 }
   0xd   :  { %p189_p6 = por %p188_p5, %p187_p4 }
   0xf   :  { %p190_p7 = pnand %p189_p6, %p183_p3 }
  0x11   :  { %193 = shalt.err (!%p190_p7)
}
  0x12   :  { %s221_s17 = smov 256   ;;  %s222_s18 = smov 16  }
  0x13   :  { %19 = dma.hbm_to_vmem [thread:$0]  %s264_s0, 256, %s14_s7, [#allocation3], %s221_s17, %s221_s17, %s222_s18  }
  0x14   :  { %216 = dma.done.wait [#allocation3], 8192  }
  0x15   :  { %217 = vsyncadd [#allocation3], 4294959104  ;;  %v23_v0 = vld [vmem:[#allocation2] sm:$0xff]  ;;  %v24_v1 = vld [vmem:[#allocation2 + $0x8] sm:$0xff] }
  0x16   :  { %v25_v2 = vld [vmem:[#allocation2 + $0x10] sm:$0xff]  ;;  %87 = vst [vmem:[#allocation5] sm:$0xff] %v23_v0  ;;  %88 = vst [vmem:[#allocation5 + $0x8] sm:$0xff] %v24_v1  ;;  %v26_v3 = vld [vmem:[#allocation2 + $0x18] sm:$0xff] }
  0x17   :  { %89 = vst [vmem:[#allocation5 + $0x10] sm:$0xff] %v25_v2  ;;  %v27_v4 = vld [vmem:[#allocation2 + $0x20] sm:$0xff]  ;;  %v28_v5 = vld [vmem:[#allocation2 + $0x28] sm:$0xff]  ;;  %90 = vst [vmem:[#allocation5 + $0x18] sm:$0xff] %v26_v3 }
  0x18   :  { %91 = vst [vmem:[#allocation5 + $0x20] sm:$0xff] %v27_v4  ;;  %92 = vst [vmem:[#allocation5 + $0x28] sm:$0xff] %v28_v5  ;;  %v29_v6 = vld [vmem:[#allocation2 + $0x30] sm:$0xff]  ;;  %v30_v7 = vld [vmem:[#allocation2 + $0x38] sm:$0xff] }
  0x19   :  { %v31_v8 = vld [vmem:[#allocation2 + $0x40] sm:$0xff]  ;;  %93 = vst [vmem:[#allocation5 + $0x30] sm:$0xff] %v29_v6  ;;  %94 = vst [vmem:[#allocation5 + $0x38] sm:$0xff] %v30_v7  ;;  %v32_v9 = vld [vmem:[#allocation2 + $0x48] sm:$0xff] }
  0x1a   :  { %95 = vst [vmem:[#allocation5 + $0x40] sm:$0xff] %v31_v8  ;;  %v33_v10 = vld [vmem:[#allocation2 + $0x50] sm:$0xff]  ;;  %v34_v11 = vld [vmem:[#allocation2 + $0x58] sm:$0xff]  ;;  %96 = vst [vmem:[#allocation5 + $0x48] sm:$0xff] %v32_v9 }
  0x1b   :  { %97 = vst [vmem:[#allocation5 + $0x50] sm:$0xff] %v33_v10  ;;  %98 = vst [vmem:[#allocation5 + $0x58] sm:$0xff] %v34_v11  ;;  %v35_v12 = vld [vmem:[#allocation2 + $0x60] sm:$0xff]  ;;  %v36_v13 = vld [vmem:[#allocation2 + $0x68] sm:$0xff] }
  0x1c   :  { %v37_v14 = vld [vmem:[#allocation2 + $0x70] sm:$0xff]  ;;  %99 = vst [vmem:[#allocation5 + $0x60] sm:$0xff] %v35_v12  ;;  %100 = vst [vmem:[#allocation5 + $0x68] sm:$0xff] %v36_v13  ;;  %v38_v15 = vld [vmem:[#allocation2 + $0x78] sm:$0xff] }
  0x1d   :  { %101 = vst [vmem:[#allocation5 + $0x70] sm:$0xff] %v37_v14  ;;  %v39_v16 = vld [vmem:[#allocation2 + $0x80] sm:$0xff]  ;;  %v40_v17 = vld [vmem:[#allocation2 + $0x88] sm:$0xff]  ;;  %102 = vst [vmem:[#allocation5 + $0x78] sm:$0xff] %v38_v15 }
  0x1e   :  { %103 = vst [vmem:[#allocation5 + $0x80] sm:$0xff] %v39_v16  ;;  %104 = vst [vmem:[#allocation5 + $0x88] sm:$0xff] %v40_v17  ;;  %v41_v18 = vld [vmem:[#allocation2 + $0x90] sm:$0xff]  ;;  %v42_v19 = vld [vmem:[#allocation2 + $0x98] sm:$0xff] }
  0x1f   :  { %v43_v20 = vld [vmem:[#allocation2 + $0xa0] sm:$0xff]  ;;  %105 = vst [vmem:[#allocation5 + $0x90] sm:$0xff] %v41_v18  ;;  %106 = vst [vmem:[#allocation5 + $0x98] sm:$0xff] %v42_v19  ;;  %v44_v21 = vld [vmem:[#allocation2 + $0xa8] sm:$0xff] }
  0x20   :  { %107 = vst [vmem:[#allocation5 + $0xa0] sm:$0xff] %v43_v20  ;;  %v45_v22 = vld [vmem:[#allocation2 + $0xb0] sm:$0xff]  ;;  %v46_v23 = vld [vmem:[#allocation2 + $0xb8] sm:$0xff]  ;;  %108 = vst [vmem:[#allocation5 + $0xa8] sm:$0xff] %v44_v21 }
  0x21   :  { %109 = vst [vmem:[#allocation5 + $0xb0] sm:$0xff] %v45_v22  ;;  %110 = vst [vmem:[#allocation5 + $0xb8] sm:$0xff] %v46_v23  ;;  %v47_v24 = vld [vmem:[#allocation2 + $0xc0] sm:$0xff]  ;;  %v48_v25 = vld [vmem:[#allocation2 + $0xc8] sm:$0xff] }
  0x22   :  { %v49_v26 = vld [vmem:[#allocation2 + $0xd0] sm:$0xff]  ;;  %111 = vst [vmem:[#allocation5 + $0xc0] sm:$0xff] %v47_v24  ;;  %112 = vst [vmem:[#allocation5 + $0xc8] sm:$0xff] %v48_v25  ;;  %v50_v27 = vld [vmem:[#allocation2 + $0xd8] sm:$0xff] }
  0x23   :  { %113 = vst [vmem:[#allocation5 + $0xd0] sm:$0xff] %v49_v26  ;;  %v51_v28 = vld [vmem:[#allocation2 + $0xe0] sm:$0xff]  ;;  %v52_v29 = vld [vmem:[#allocation2 + $0xe8] sm:$0xff]  ;;  %114 = vst [vmem:[#allocation5 + $0xd8] sm:$0xff] %v50_v27 }
  0x24   :  { %115 = vst [vmem:[#allocation5 + $0xe0] sm:$0xff] %v51_v28  ;;  %116 = vst [vmem:[#allocation5 + $0xe8] sm:$0xff] %v52_v29  ;;  %v53_v30 = vld [vmem:[#allocation2 + $0xf0] sm:$0xff]  ;;  %v54_v31 = vld [vmem:[#allocation2 + $0xf8] sm:$0xff] }
  0x25   :  { %v55_v32 = vld [vmem:[#allocation2 + $0x100] sm:$0xff]  ;;  %117 = vst [vmem:[#allocation5 + $0xf0] sm:$0xff] %v53_v30  ;;  %118 = vst [vmem:[#allocation5 + $0xf8] sm:$0xff] %v54_v31  ;;  %v56_v33 = vld [vmem:[#allocation2 + $0x108] sm:$0xff] }
  0x26   :  { %119 = vst [vmem:[#allocation5 + $0x100] sm:$0xff] %v55_v32  ;;  %v57_v34 = vld [vmem:[#allocation2 + $0x110] sm:$0xff]  ;;  %v58_v35 = vld [vmem:[#allocation2 + $0x118] sm:$0xff]  ;;  %120 = vst [vmem:[#allocation5 + $0x108] sm:$0xff] %v56_v33 }
  0x27   :  { %121 = vst [vmem:[#allocation5 + $0x110] sm:$0xff] %v57_v34  ;;  %122 = vst [vmem:[#allocation5 + $0x118] sm:$0xff] %v58_v35  ;;  %v59_v36 = vld [vmem:[#allocation2 + $0x120] sm:$0xff]  ;;  %v60_v37 = vld [vmem:[#allocation2 + $0x128] sm:$0xff] }
  0x28   :  { %v61_v38 = vld [vmem:[#allocation2 + $0x130] sm:$0xff]  ;;  %123 = vst [vmem:[#allocation5 + $0x120] sm:$0xff] %v59_v36  ;;  %124 = vst [vmem:[#allocation5 + $0x128] sm:$0xff] %v60_v37  ;;  %v62_v39 = vld [vmem:[#allocation2 + $0x138] sm:$0xff] }
  0x29   :  { %125 = vst [vmem:[#allocation5 + $0x130] sm:$0xff] %v61_v38  ;;  %v63_v40 = vld [vmem:[#allocation2 + $0x140] sm:$0xff]  ;;  %v64_v41 = vld [vmem:[#allocation2 + $0x148] sm:$0xff]  ;;  %126 = vst [vmem:[#allocation5 + $0x138] sm:$0xff] %v62_v39 }
  0x2a   :  { %127 = vst [vmem:[#allocation5 + $0x140] sm:$0xff] %v63_v40  ;;  %128 = vst [vmem:[#allocation5 + $0x148] sm:$0xff] %v64_v41  ;;  %v65_v42 = vld [vmem:[#allocation2 + $0x150] sm:$0xff]  ;;  %v66_v43 = vld [vmem:[#allocation2 + $0x158] sm:$0xff] }
  0x2b   :  { %v67_v44 = vld [vmem:[#allocation2 + $0x160] sm:$0xff]  ;;  %129 = vst [vmem:[#allocation5 + $0x150] sm:$0xff] %v65_v42  ;;  %130 = vst [vmem:[#allocation5 + $0x158] sm:$0xff] %v66_v43  ;;  %v68_v45 = vld [vmem:[#allocation2 + $0x168] sm:$0xff] }
  0x2c   :  { %131 = vst [vmem:[#allocation5 + $0x160] sm:$0xff] %v67_v44  ;;  %v69_v46 = vld [vmem:[#allocation2 + $0x170] sm:$0xff]  ;;  %v70_v47 = vld [vmem:[#allocation2 + $0x178] sm:$0xff]  ;;  %132 = vst [vmem:[#allocation5 + $0x168] sm:$0xff] %v68_v45 }
  0x2d   :  { %133 = vst [vmem:[#allocation5 + $0x170] sm:$0xff] %v69_v46  ;;  %134 = vst [vmem:[#allocation5 + $0x178] sm:$0xff] %v70_v47  ;;  %v71_v48 = vld [vmem:[#allocation2 + $0x180] sm:$0xff]  ;;  %v72_v49 = vld [vmem:[#allocation2 + $0x188] sm:$0xff] }
  0x2e   :  { %v73_v50 = vld [vmem:[#allocation2 + $0x190] sm:$0xff]  ;;  %135 = vst [vmem:[#allocation5 + $0x180] sm:$0xff] %v71_v48  ;;  %136 = vst [vmem:[#allocation5 + $0x188] sm:$0xff] %v72_v49  ;;  %v74_v51 = vld [vmem:[#allocation2 + $0x198] sm:$0xff] }
  0x2f   :  { %137 = vst [vmem:[#allocation5 + $0x190] sm:$0xff] %v73_v50  ;;  %v75_v52 = vld [vmem:[#allocation2 + $0x1a0] sm:$0xff]  ;;  %v76_v53 = vld [vmem:[#allocation2 + $0x1a8] sm:$0xff]  ;;  %138 = vst [vmem:[#allocation5 + $0x198] sm:$0xff] %v74_v51 }
  0x30   :  { %139 = vst [vmem:[#allocation5 + $0x1a0] sm:$0xff] %v75_v52  ;;  %140 = vst [vmem:[#allocation5 + $0x1a8] sm:$0xff] %v76_v53  ;;  %v77_v54 = vld [vmem:[#allocation2 + $0x1b0] sm:$0xff]  ;;  %v78_v55 = vld [vmem:[#allocation2 + $0x1b8] sm:$0xff] }
  0x31   :  { %v79_v56 = vld [vmem:[#allocation2 + $0x1c0] sm:$0xff]  ;;  %141 = vst [vmem:[#allocation5 + $0x1b0] sm:$0xff] %v77_v54  ;;  %142 = vst [vmem:[#allocation5 + $0x1b8] sm:$0xff] %v78_v55  ;;  %v80_v57 = vld [vmem:[#allocation2 + $0x1c8] sm:$0xff] }
  0x32   :  { %143 = vst [vmem:[#allocation5 + $0x1c0] sm:$0xff] %v79_v56  ;;  %v81_v58 = vld [vmem:[#allocation2 + $0x1d0] sm:$0xff]  ;;  %v82_v59 = vld [vmem:[#allocation2 + $0x1d8] sm:$0xff]  ;;  %144 = vst [vmem:[#allocation5 + $0x1c8] sm:$0xff] %v80_v57 }
  0x33   :  { %145 = vst [vmem:[#allocation5 + $0x1d0] sm:$0xff] %v81_v58  ;;  %146 = vst [vmem:[#allocation5 + $0x1d8] sm:$0xff] %v82_v59  ;;  %v83_v60 = vld [vmem:[#allocation2 + $0x1e0] sm:$0xff]  ;;  %v84_v61 = vld [vmem:[#allocation2 + $0x1e8] sm:$0xff] }
  0x34   :  { %v85_v62 = vld [vmem:[#allocation2 + $0x1f0] sm:$0xff]  ;;  %147 = vst [vmem:[#allocation5 + $0x1e0] sm:$0xff] %v83_v60  ;;  %148 = vst [vmem:[#allocation5 + $0x1e8] sm:$0xff] %v84_v61  ;;  %v86_v63 = vld [vmem:[#allocation2 + $0x1f8] sm:$0xff] }
  0x35   :  { %149 = vst [vmem:[#allocation5 + $0x1f0] sm:$0xff] %v85_v62  ;;  %150 = vst [vmem:[#allocation5 + $0x1f8] sm:$0xff] %v86_v63 }
  0x36   :  { %155 = vsyncadd [#allocation4], 7936  ;;  %s223_s0 = smov [#allocation5]  }
  0x37   :  { %s156_s21 = sshll.u32 %s223_s0, 4  ;;  %s157_s21 = int_to_ptr.vmem [resolvable:$true] %s156_s21 }
  0x38   :  { %s194_s22 = scalar_lea.vmem %s157_s21, 256  ;;  %s198_s23 = scalar_lea.vmem %s157_s21, 8192 }
  0x39   :  { %p195_p8 = scmp.ne.s32.totalorder %s157_s21, %s194_s22  ;;  %p199_p9 = scmp.lt.s32.totalorder %s157_s21, %s157_s21 }
  0x3a   :  { %p200_p10 = scmp.lt.s32.totalorder %s198_s23, %s194_s22 }
  0x3c   :  { %p201_p11 = por %p200_p10, %p199_p9 }
  0x3e   :  { %p202_p12 = pnand %p201_p11, %p195_p8 }
  0x40   :  { %205 = shalt.err (!%p202_p12)
}
  0x41   :  { %s206_s26 = scalar_lea.hbm %s265_s1, 256 }
  0x42   :  { %p207_p13 = scmp.ne.s32.totalorder %s265_s1, %s206_s26  ;;  %p210_p0 = scmp.lt.u32.totalorder %s206_s26, %s265_s1 }
  0x44   :  { %p212_p1 = pnand %p210_p0, %p207_p13 }
  0x46   :  { %215 = shalt.err (!%p212_p1)
}
  0x47   :  { %162 = dma.vmem_to_hbm [thread:$0]  %s157_s21, 256, %s265_s1, [#allocation4], %s221_s17, %s221_s17, %s222_s18  }
  0x48   :  { %218 = dma.done.wait [#allocation4], 8192  }
  0x49   :  { %219 = vsyncadd [#allocation4], 4294959104 }
  0x4a   :  { %166 = vsyncpa [#allocation3], 1 }
  0x4b   :  { %167 = vsyncpa [#allocation4], 1 }

</bundles_post_ra>
